<compile_context>
chip_gen: v6e
topology: v6e:2x2x1
jax: 0.10.0
libtpu: 0.0.40
codegen_flags: <defaults>
</compile_context>

<pallas_src>
import functools

import jax
import jax.numpy as jnp
from jax.experimental import pallas as pl
from jax.experimental.pallas import tpu as pltpu


# ---------------------------------------------------------------------------
# Kernel: Out = act(A_hat @ XW + b), rows parallel, nonzero col-blocks reduced.
# ---------------------------------------------------------------------------
def aggregate_kernel(cols_ref, cnt_ref, a_ref, xw_ref, b_ref, o_ref, acc_ref, *,
                     max_nnz, tk, num_valid, activation):
    """cols_ref: (nr*max_nnz,) int32 SMEM — nonzero column-block ids per row tile.
    cnt_ref:  (nr,) int32 SMEM — number of valid entries per row tile.
    a_ref:    (tm, tk) bf16 — A_hat block (i, cols[i*max_nnz+k]) streamed by BlockSpec.
    xw_ref:   (n_pad, d) bf16 — whole XW, VMEM-resident (constant index_map).
    """
    i = pl.program_id(0)
    k = pl.program_id(1)

    @pl.when(k == 0)
    def _init():
        acc_ref[...] = jnp.zeros_like(acc_ref)

    @pl.when(k < cnt_ref[i])
    def _accumulate():
        col = cols_ref[i * max_nnz + k]
        start = pl.multiple_of(col * tk, tk)
        acc_ref[...] += jnp.dot(
            a_ref[...], xw_ref[pl.ds(start, tk), :],
            preferred_element_type=jnp.float32,
        )

    @pl.when(k == pl.num_programs(1) - 1)
    def _finalize():
        z = acc_ref[...] + b_ref[...]                      # bias once, in f32
        if activation == "relu":
            o_ref[...] = jnp.maximum(z, 0.0).astype(o_ref.dtype)
        else:  # masked log_softmax over the (padded) class dim
            col_ids = jax.lax.broadcasted_iota(jnp.int32, z.shape, 1)
            valid = col_ids < num_valid
            zm = jnp.where(valid, z, -1e30)
            m = jnp.max(zm, axis=1, keepdims=True)
            zs = zm - m
            ez = jnp.where(valid, jnp.exp(zs), 0.0)
            lse = jnp.log(jnp.sum(ez, axis=1, keepdims=True))
            o_ref[...] = (zs - lse).astype(o_ref.dtype)


# ---------------------------------------------------------------------------
# pallas_call wrapper
# ---------------------------------------------------------------------------
def _aggregate(a_p, xw_p, b_p, cols_flat, cnt, *, t, max_nnz, activation,
               num_valid, out_dtype, nnz_blocks):
    n_pad = a_p.shape[0]
    d = xw_p.shape[1]
    nr = n_pad // t

    kernel = functools.partial(
        aggregate_kernel, max_nnz=max_nnz, tk=t,
        num_valid=num_valid, activation=activation)

    cost = pl.CostEstimate(
        flops=2 * nnz_blocks * t * t * d,
        transcendentals=n_pad * d if activation == "log_softmax" else 0,
        bytes_accessed=(nnz_blocks * t * t * a_p.dtype.itemsize      # only nonzero A blocks
                        + n_pad * d * xw_p.dtype.itemsize            # XW streamed once
                        + n_pad * d * jnp.dtype(out_dtype).itemsize),
    )

    return pl.pallas_call(
        kernel,
        out_shape=jax.ShapeDtypeStruct((n_pad, d), out_dtype),
        grid_spec=pltpu.PrefetchScalarGridSpec(
            num_scalar_prefetch=2,
            grid=(nr, max_nnz),
            in_specs=[
                # A_hat: only nonzero blocks are ever DMA'd (CSR-of-blocks index_map).
                pl.BlockSpec((t, t),
                             lambda i, k, cols, cnt_: (i, cols[i * max_nnz + k])),
                # XW: whole array, constant block index -> DMA'd once, stays in VMEM.
                pl.BlockSpec((n_pad, d), lambda i, k, cols, cnt_: (0, 0)),
                # bias
                pl.BlockSpec((1, d), lambda i, k, cols, cnt_: (0, 0)),
            ],
            out_specs=pl.BlockSpec((t, d), lambda i, k, cols, cnt_: (i, 0)),
            scratch_shapes=[pltpu.VMEM((t, d), jnp.float32)],
        ),
        compiler_params=pltpu.CompilerParams(
            dimension_semantics=("parallel", "arbitrary"),
            vmem_limit_bytes=32 * 1024 * 1024,
        ),
        cost_estimate=cost,
    )(cols_flat, cnt, a_p, xw_p, b_p)


# ---------------------------------------------------------------------------
# Host-side helpers
# ---------------------------------------------------------------------------
def _round_up(x, m):
    return (x + m - 1) // m * m


def _pad2(x, rows, cols):
    r, c = x.shape
    return jnp.pad(x, ((0, rows - r), (0, cols - c)))


def _block_structure(a_hat, edge_index, n, n_pad, t):
    """CSR-of-blocks for the (n_pad/t, n_pad/t) grid of A_hat tiles.

    Built O(E) from edge_index (plus the self-loop diagonal) when available;
    falls back to a boolean reduce of a_hat otherwise.
    Returns (cols_flat int32 (nr*max_nnz,), cnt int32 (nr,), max_nnz, nnz_blocks).
    """
    nr = n_pad // t
    if edge_index is not None:
        src, dst = edge_index[0], edge_index[1]
        mask = jnp.zeros((nr, nr), jnp.bool_)
        mask = mask.at[dst // t, src // t].set(True)        # A[dst, src] != 0
        nodes = jnp.arange(n)
        mask = mask.at[nodes // t, nodes // t].set(True)    # self loops
    else:
        nz = _pad2((a_hat != 0).astype(jnp.int32), n_pad, n_pad)
        mask = nz.reshape(nr, t, nr, t).sum(axis=(1, 3)) > 0

    cnt = mask.sum(axis=1).astype(jnp.int32)
    order = jnp.argsort(jnp.logical_not(mask), axis=1, stable=True).astype(jnp.int32)
    max_nnz = max(int(cnt.max()), 1)
    # Pad the per-row list with the last valid block index so the block index
    # does not change on tail iterations (no extra DMA for skipped steps).
    last = order[jnp.arange(nr), jnp.maximum(cnt - 1, 0)]
    j = jnp.arange(nr)[None, :]
    cols = jnp.where(j < cnt[:, None], order, last[:, None])[:, :max_nnz]
    nnz_blocks = int(cnt.sum())
    return cols.reshape(-1).astype(jnp.int32), cnt, max_nnz, nnz_blocks


# ---------------------------------------------------------------------------
# Full Net.forward
# ---------------------------------------------------------------------------
def gcn_net(a_hat, x, w1, b1, w2, b2, edge_index=None, *, tile=256):
    """h   = relu(A_hat @ (X @ W1) + b1)        # CRD (GCNConv + ReLU)
       # dropout: eval mode -> identity         # CRD.p
       z   = A_hat @ (h @ W2) + b2              # CLS (GCNConv)
       out = log_softmax(z, axis=1)
    """
    n, _ = x.shape
    hdim = w1.shape[1]
    c = w2.shape[1]

    bf16 = jnp.bfloat16
    t = min(tile, _round_up(n, 128))          # tile size (rows == cols of A blocks)
    n_pad = _round_up(n, t)
    h_pad = _round_up(hdim, 128)
    c_pad = _round_up(c, 128)

    cols_flat, cnt, max_nnz, nnz_blocks = _block_structure(
        a_hat, edge_index, n, n_pad, t)

    a_p = _pad2(a_hat, n_pad, n_pad).astype(bf16)     # single padded bf16 copy of A
    b1_p = _pad2(b1, 1, h_pad).astype(jnp.float32)
    b2_p = _pad2(b2, 1, c_pad).astype(jnp.float32)

    # Tiny dense projections (O(N*F*d) << O(nnz_blocks*t^2*d)): plain XLA dots.
    w1_b = w1.astype(bf16)
    w2_p = _pad2(w2.astype(bf16), h_pad, c_pad)
    xw1 = jnp.dot(x.astype(bf16), w1_b,
                  preferred_element_type=jnp.float32).astype(bf16)
    xw1_p = _pad2(xw1, n_pad, h_pad)

    # Layer 1: GCNConv + ReLU
    h1 = _aggregate(a_p, xw1_p, b1_p, cols_flat, cnt, t=t, max_nnz=max_nnz,
                    activation="relu", num_valid=h_pad, out_dtype=bf16,
                    nnz_blocks=nnz_blocks)
    # dropout: eval mode -> identity

    # Layer 2: GCNConv + log_softmax (padded class columns masked in-kernel)
    hw2 = jnp.dot(h1, w2_p, preferred_element_type=jnp.float32).astype(bf16)
    out = _aggregate(a_p, hw2, b2_p, cols_flat, cnt, t=t, max_nnz=max_nnz,
                     activation="log_softmax", num_valid=c,
                     out_dtype=jnp.float32, nnz_blocks=nnz_blocks)
    return out[:n, :c]


# ---------------------------------------------------------------------------
# Glue: dense symmetric normalized adjacency (PyG gcn_norm) + init
# ---------------------------------------------------------------------------
def build_normalized_adjacency(edge_index, num_nodes):
    """Add self-loops, then D^{-1/2} (A + I) D^{-1/2}.  A[dst, src] = 1."""
    src, dst = edge_index[0], edge_index[1]
    a = jnp.zeros((num_nodes, num_nodes), jnp.float32).at[dst, src].set(1.0)
    a = a + jnp.eye(num_nodes, dtype=jnp.float32)
    deg = jnp.sum(a, axis=1)
    dinv = jnp.where(deg > 0, 1.0 / jnp.sqrt(deg), 0.0)
    return dinv[:, None] * a * dinv[None, :]


def glorot(key, shape):
    fan_in, fan_out = shape
    limit = jnp.sqrt(6.0 / (fan_in + fan_out))
    return jax.random.uniform(key, shape, jnp.float32, -limit, limit)


if __name__ == "__main__":
    # Small synthetic "Planetoid-like" problem with community structure so the
    # 3x3 block grid has genuinely empty A_hat tiles (exercises the DMA skip,
    # the tail guard, and row/col padding: 700 -> 768 padded nodes).
    N = 700
    COMM = 256        # community width (aligned to the 256 tile)
    F_IN = 16         # dataset.num_features
    HIDDEN = 32       # args.hidden
    C = 8             # dataset.num_classes
    E_PER = 256       # directed edges per community (before symmetrization)

    key = jax.random.PRNGKey(0)
    k_x, k_e, k_w1, k_w2 = jax.random.split(key, 4)
    k1, k2, k3, kb = jax.random.split(k_e, 4)

    x = jax.random.normal(k_x, (N, F_IN), jnp.float32)

    def _edges(k, lo, hi, m):
        s = jax.random.randint(k, (m,), lo, hi)
        d = jax.random.randint(jax.random.fold_in(k, 1), (m,), lo, hi)
        return s, d

    s1, d1 = _edges(k1, 0, COMM, E_PER)
    s2, d2 = _edges(k2, COMM, 2 * COMM, E_PER)
    s3, d3 = _edges(k3, 2 * COMM, N, E_PER)
    sb = jax.random.randint(kb, (16,), 0, COMM)                      # bridge 0 <-> 1
    db = jax.random.randint(jax.random.fold_in(kb, 1), (16,), COMM, 2 * COMM)

    src = jnp.concatenate([s1, s2, s3, sb])
    dst = jnp.concatenate([d1, d2, d3, db])
    edge_index = jnp.stack(
        [jnp.concatenate([src, dst]), jnp.concatenate([dst, src])], axis=0
    )

    a_hat = build_normalized_adjacency(edge_index, N)

    w1 = glorot(k_w1, (F_IN, HIDDEN))
    b1 = jnp.zeros((1, HIDDEN), jnp.float32)
    w2 = glorot(k_w2, (HIDDEN, C))
    b2 = jnp.zeros((1, C), jnp.float32)

    out = gcn_net(a_hat, x, w1, b1, w2, b2, edge_index=edge_index)
    out = jax.block_until_ready(out)

    # Reference with the same bf16 quantization chain (f32 accumulation), pure JAX.
    bf = lambda tnsr: tnsr.astype(jnp.bfloat16)
    a_b = bf(a_hat)
    xw1_r = bf(jnp.dot(bf(x), bf(w1), preferred_element_type=jnp.float32))
    h_r = bf(jnp.maximum(
        jnp.dot(a_b, xw1_r, preferred_element_type=jnp.float32) + b1, 0.0))
    hw2_r = bf(jnp.dot(h_r, bf(w2), preferred_element_type=jnp.float32))
    z_r = jnp.dot(a_b, hw2_r, preferred_element_type=jnp.float32) + b2
    ref = jax.nn.log_softmax(z_r, axis=1)

    assert out.shape == (N, C)
    assert bool(jnp.all(jnp.isfinite(out)))
    assert jnp.allclose(out, ref, atol=5e-2, rtol=5e-2), (
        float(jnp.max(jnp.abs(out - ref)))
    )

    print("KERNEL_OK")
</pallas_src>

<mosaic_0001>
module attributes {stable_mosaic.version = 11 : i64} {
  func.func @aggregate_kernel(%arg0: i32, %arg1: i32, %arg2: memref<6xi32, #tpu.memory_space<smem>>, %arg3: memref<3xi32, #tpu.memory_space<smem>>, %arg4: memref<256x256xbf16, #tpu.memory_space<vmem>>, %arg5: memref<768x128xbf16, #tpu.memory_space<vmem>>, %arg6: memref<1x128xf32, #tpu.memory_space<vmem>>, %arg7: memref<256x128xbf16, #tpu.memory_space<vmem>>, %arg8: memref<256x128xf32, #tpu.memory_space<vmem>>) attributes {dimension_semantics = [#tpu.dimension_semantics<parallel>, #tpu.dimension_semantics<arbitrary>], iteration_bounds = array<i64: 3, 2>, scalar_prefetch = 2 : i64, scratch_operands = 1 : i64, tpu.core_type = #tpu.core_type<tc>, window_params = [{transform_indices = @transform_0, window_bounds = array<i64: 256, 256>}, {pipeline_mode = #tpu.pipeline_mode<synchronous>, transform_indices = @transform_1, window_bounds = array<i64: 768, 128>}, {pipeline_mode = #tpu.pipeline_mode<synchronous>, transform_indices = @transform_2, window_bounds = array<i64: 1, 128>}, {transform_indices = @transform_3, window_bounds = array<i64: 256, 128>}]} {
    %c0_i32 = arith.constant 0 : i32
    %0 = arith.cmpi eq, %arg1, %c0_i32 : i32
    %1 = arith.extui %0 : i1 to i32
    %c0_i32_0 = arith.constant 0 : i32
    %2 = arith.cmpi ne, %1, %c0_i32_0 : i32
    scf.if %2 {
      %cst = arith.constant 0.000000e+00 : f32
      %11 = vector.broadcast %cst : f32 to vector<256x128xf32>
      %c0 = arith.constant 0 : index
      %c0_3 = arith.constant 0 : index
      %12 = vector.load %arg8[%c0, %c0_3] : memref<256x128xf32, #tpu.memory_space<vmem>>, vector<256x128xf32>
      tpu.vector_store %arg8[%c0, %c0_3], %11 {strides = array<i32>} : memref<256x128xf32, #tpu.memory_space<vmem>>, vector<256x128xf32>,
    } else {
    }
    %3 = arith.index_cast %arg0 : i32 to index
    %4 = memref.load %arg3[%3] : memref<3xi32, #tpu.memory_space<smem>>
    %5 = arith.cmpi slt, %arg1, %4 : i32
    %6 = arith.extui %5 : i1 to i32
    %c0_i32_1 = arith.constant 0 : i32
    %7 = arith.cmpi ne, %6, %c0_i32_1 : i32
    scf.if %7 {
      %c2_i32 = arith.constant 2 : i32
      %11 = arith.muli %arg0, %c2_i32 : i32
      %12 = arith.addi %11, %arg1 : i32
      %13 = arith.index_cast %12 : i32 to index
      %14 = memref.load %arg2[%13] : memref<6xi32, #tpu.memory_space<smem>>
      %c256_i32 = arith.constant 256 : i32
      %15 = arith.muli %14, %c256_i32 : i32
      %16 = tpu.assume_multiple %15, 256 : i32
      %c0 = arith.constant 0 : index
      %c0_3 = arith.constant 0 : index
      %17 = vector.load %arg8[%c0, %c0_3] : memref<256x128xf32, #tpu.memory_space<vmem>>, vector<256x128xf32>
      %c0_4 = arith.constant 0 : index
      %c0_5 = arith.constant 0 : index
      %18 = vector.load %arg4[%c0_4, %c0_5] : memref<256x256xbf16, #tpu.memory_space<vmem>>, vector<256x256xbf16>
      %19 = arith.index_cast %16 : i32 to index
      %c0_6 = arith.constant 0 : index
      %20 = vector.load %arg5[%19, %c0_6] : memref<768x128xbf16, #tpu.memory_space<vmem>>, vector<256x128xbf16>
      %cst = arith.constant dense<0.000000e+00> : vector<256x128xf32>
      %21 = tpu.matmul %18, %20, %cst {dimension_numbers = #tpu.dot_dimension_numbers<[1], [0], [0], [1], [0, 0, 1, 1], [], []>} : vector<256x256xbf16>, vector<256x128xbf16>, vector<256x128xf32> -> vector<256x128xf32>
      %22 = arith.addf %17, %21 : vector<256x128xf32>
      %c0_7 = arith.constant 0 : index
      %c0_8 = arith.constant 0 : index
      %23 = vector.load %arg8[%c0_7, %c0_8] : memref<256x128xf32, #tpu.memory_space<vmem>>, vector<256x128xf32>
      tpu.vector_store %arg8[%c0_7, %c0_8], %22 {strides = array<i32>} : memref<256x128xf32, #tpu.memory_space<vmem>>, vector<256x128xf32>,
    } else {
    }
    %c1_i32 = arith.constant 1 : i32
    %8 = arith.cmpi eq, %arg1, %c1_i32 : i32
    %9 = arith.extui %8 : i1 to i32
    %c0_i32_2 = arith.constant 0 : i32
    %10 = arith.cmpi ne, %9, %c0_i32_2 : i32
    scf.if %10 {
      %c0 = arith.constant 0 : index
      %c0_3 = arith.constant 0 : index
      %11 = vector.load %arg8[%c0, %c0_3] : memref<256x128xf32, #tpu.memory_space<vmem>>, vector<256x128xf32>
      %c0_4 = arith.constant 0 : index
      %c0_5 = arith.constant 0 : index
      %12 = vector.load %arg6[%c0_4, %c0_5] : memref<1x128xf32, #tpu.memory_space<vmem>>, vector<1x128xf32>
      %13 = vector.broadcast %12 : vector<1x128xf32> to vector<256x128xf32>
      %14 = arith.addf %11, %13 : vector<256x128xf32>
      %cst = arith.constant 0.000000e+00 : f32
      %15 = vector.broadcast %cst : f32 to vector<256x128xf32>
      %16 = arith.maximumf %14, %15 : vector<256x128xf32>
      %17 = arith.truncf %16 : vector<256x128xf32> to vector<256x128xbf16>
      %c0_6 = arith.constant 0 : index
      %c0_7 = arith.constant 0 : index
      %18 = vector.load %arg7[%c0_6, %c0_7] : memref<256x128xbf16, #tpu.memory_space<vmem>>, vector<256x128xbf16>
      tpu.vector_store %arg7[%c0_6, %c0_7], %17 {strides = array<i32>} : memref<256x128xbf16, #tpu.memory_space<vmem>>, vector<256x128xbf16>,
    } else {
    }
    return
  }
  func.func @transform_0(%arg0: i32, %arg1: i32, %arg2: memref<6xi32, #tpu.memory_space<smem>>, %arg3: memref<3xi32, #tpu.memory_space<smem>>) -> (i32, i32) {
    %c2_i32 = arith.constant 2 : i32
    %0 = arith.muli %arg0, %c2_i32 : i32
    %1 = arith.addi %0, %arg1 : i32
    %2 = arith.index_cast %1 : i32 to index
    %3 = memref.load %arg2[%2] : memref<6xi32, #tpu.memory_space<smem>>
    %c0_i32 = arith.constant 0 : i32
    return %arg0, %3 : i32, i32
  }
  func.func @transform_1(%arg0: i32, %arg1: i32, %arg2: memref<6xi32, #tpu.memory_space<smem>>, %arg3: memref<3xi32, #tpu.memory_space<smem>>) -> (i32, i32) {
    %c0_i32 = arith.constant 0 : i32
    %c0_i32_0 = arith.constant 0 : i32
    %c0_i32_1 = arith.constant 0 : i32
    return %c0_i32, %c0_i32_0 : i32, i32
  }
  func.func @transform_2(%arg0: i32, %arg1: i32, %arg2: memref<6xi32, #tpu.memory_space<smem>>, %arg3: memref<3xi32, #tpu.memory_space<smem>>) -> (i32, i32) {
    %c0_i32 = arith.constant 0 : i32
    %c0_i32_0 = arith.constant 0 : i32
    %c0_i32_1 = arith.constant 0 : i32
    return %c0_i32, %c0_i32_0 : i32, i32
  }
  func.func @transform_3(%arg0: i32, %arg1: i32, %arg2: memref<6xi32, #tpu.memory_space<smem>>, %arg3: memref<3xi32, #tpu.memory_space<smem>>) -> (i32, i32) {
    %c0_i32 = arith.constant 0 : i32
    %c0_i32_0 = arith.constant 0 : i32
    return %arg0, %c0_i32 : i32, i32
  }
}

</mosaic_0001>

<bundles_post_ra>
// kernel: tpu_custom_call.1
= control target key start
LH: loop header
LB: loop body
LE: loop exit
PB: predicated region body
PF: predicated region fallthrough
CT: control target
= control target key end

     0   :  { %s2065_s18 = smov [#allocation4]   ;;  %s2066_s21 = smov [#allocation5]   ;;  %s2506_s0 = inlined_call_operand.hbm [shape: s32[6], index: 0, kind: input, shape index: {}]   ;;  %s2507_s2 = inlined_call_operand.hbm [shape: bf16[768,768], index: 2, kind: input, shape index: {}]   ;;  %s2508_s3 = inlined_call_operand.hbm [shape: bf16[768,128], index: 3, kind: input, shape index: {}]   ;;  %s2509_s4 = inlined_call_operand.hbm [shape: f32[1,128], index: 4, kind: input, shape index: {}]   ;;  %s2510_s5 = inlined_call_operand.hbm [shape: bf16[768,128], index: 5, kind: output, shape index: {}]   ;;  %s2511_s1 = inlined_call_operand.hbm [shape: s32[3], index: 1, kind: input, shape index: {}]  }
   0x1   :  { %2529 = sst [smem:[#allocation28_spill]] %s2508_s3 }
   0x2   :  { %2530 = sst [smem:[#allocation29_spill]] %s2509_s4 }
   0x3   :  { %2531 = sst [smem:[#allocation30_spill]] %s2510_s5 }
   0x4   :  { %11 = dma.hbm_to_smem %s2506_s0, 16, %s2065_s18, [#allocation3] }
   0x5   :  { %13 = dma.hbm_to_smem %s2511_s1, 16, %s2066_s21, [#allocation3] }
   0x6   :  { %2007 = dma.done.wait [#allocation3], 32 }
   0x7   :  { %2008 = vsyncadd [#allocation3], 4294967264 }
   0x8   :  { %15 = sfence }
   0x9   :  { %16 = vsyncpa [#allocation7], 0 }
   0xa   :  { %18 = vsyncpa [#allocation7 + $0x1], 0 }
   0xb   :  { %19 = vsyncpa [#allocation10], 0 }
   0xc   :  { %20 = vsyncpa [#allocation8], 0 }
   0xd   :  { %22 = vsyncpa [#allocation8 + $0x1], 0  ;;  %s2115_s24 = smov 0   ;;  %s2117_s25 = smov 0  }
   0xe   :  { %s2119_s26 = smov 0   ;;  %s2121_s0 = smov 0  }
   0xf   :  { %s2123_s27 = smov 0   ;;  %s2125_s28 = smov 0  }
  0x10   :  { %s2127_s1 = smov 0   ;;  %s2129_s29 = smov 0  }
  0x11   :  { %s2131_s30 = smov 0   ;;  %s2133_s6 = smov 0  }
  0x12   :  { %s2135_s7 = smov 0  }
  0x13 LB: > { %2532 = sst [smem:[#allocation19_spill]] %s2023_s24  ;;  %s1272_s8 = sadd.s32 4294967295, %s2063_s7   ;;  %s2063_s7 = sphi %s2135_s7, %s28_s7   ;;  %s2059_s6 = sphi %s2133_s6, %s2578_s6   ;;  %s2055_s30 = sphi %s2131_s30, %s2569_s30   ;;  %s2051_s29 = sphi %s2129_s29, %s2577_s29   ;;  %s2047_s1 = sphi %s2127_s1, %s2568_s1   ;;  %s2043_s28 = sphi %s2125_s28, %s2576_s28   ;;  %s2039_s27 = sphi %s2123_s27, %s2575_s27   ;;  %s2035_s0 = sphi %s2121_s0, %s2574_s0   ;;  %s2031_s26 = sphi %s2119_s26, %s2573_s26   ;;  %s2027_s25 = sphi %s2117_s25, %s2572_s25   ;;  %s2023_s24 = sphi %s2115_s24, %s2571_s24  }
  0x14   : > { %2533 = sst [smem:[#allocation20_spill]] %s2031_s26  ;;  %s1273_s9 = sadd.s32 4294967294, %s2063_s7  }
  0x15   : > { %2534 = sst [smem:[#allocation21_spill]] %s2055_s30  ;;  %p68_p0 = scmp.ne.s32.totalorder %s2039_s27, %s2035_s0 }
  0x16   : > { %2535 = sst [smem:[#allocation22_spill]] %s2063_s7  ;;  %p2173_p2 = scmp.eq.s32.totalorder %s1272_s8, 0 }
  0x17   : > { %p133_p4 = scmp.ne.s32.totalorder %s2031_s26, %s2027_s25  ;;  %p134_p6 = scmp.eq.s32.totalorder %s1272_s8, 5 }
  0x18   : > { %s2536_s10 = scalar_select %p2173_p2, 1, 0 }
  0x19   : > { %p2182_p5 = por %p2173_p2, %p68_p0  ;;  %p139_p7 = scmp.ne.s32.totalorder %s2027_s25, %s2023_s24 }
  0x1a   : > { %p140_p8 = scmp.eq.s32.totalorder %s1273_s9, 5  ;;  %p2188_p9 = por %p134_p6, %p133_p4 }
  0x1b   : > { %s2537_s11 = scalar_select %p2182_p5, 1, 0 }
  0x1c   : > { %s2538_s12 = scalar_select %p2188_p9, 1, 0 }
  0x1d   : > { %p1276_p10 = scmp.ge.s32.totalorder %s2063_s7, 1  ;;  %p2193_p11 = por %p140_p8, %p139_p7 }
  0x1e   : > { %2539 = sst [smem:[#allocation23_spill]] %s2538_s12  ;;  %p147_p12 = scmp.lt.s32.totalorder %s2063_s7, 7 }
  0x1f   : > { %s2540_s13 = scalar_select %p2193_p11, 1, 0 }
  0x20   : > { %p2198_p13 = pnand %p1276_p10, %p147_p12  ;;  %s2067_s15 = smov [#allocation9]  }
  0x21   : > { %2541 = sst [smem:[#allocation24_spill]] %s2540_s13  ;;  %s159_s16 = sshll.u32 %s2067_s15, 4  ;;  %s160_s16 = int_to_ptr.vmem [resolvable:$true] %s159_s16 }
  0x22   : > { %s2542_s14 = scalar_select %p2198_p13, 1, 0 }
  0x23   : > { %p1654_p0 = pneg %p2198_p13  ;;  %s2068_s18 = smov [#allocation11]  }
  0x24   : > { %s173_s19 = sshll.u32 %s2068_s18, 4  ;;  %s1868_s20 = scalar_lea.vmem %s160_s16, 6144  ;;  %s174_s19 = int_to_ptr.vmem [resolvable:$true] %s173_s19 }
  0x25   : > { %p2206_p4 = pnand %p1654_p0, %p2173_p2  ;;  %p1869_p7 = scmp.ne.s32.totalorder %s160_s16, %s1868_s20 }
  0x26   : > { %p1876_p12 = scmp.lt.s32.totalorder %s160_s16, %s160_s16  ;;  %p1877_p3 = scmp.lt.s32.totalorder %s1868_s20, %s1868_s20 }
  0x27   : > { %p1859_p6 = pneg %p2206_p4 }
  0x28   : > { %p1878_p1 = por %p1877_p3, %p1876_p12 }
  0x29   : > { %p1871_p8 = pnand %p1869_p7, %p1859_p6 }
  0x2b   : > { %p1872_p10 = pneg %p1871_p8 }
  0x2d   : > { %p1879_p0 = pnand %p1878_p1, %p1872_p10 }
  0x2f   : > { %1882 = shalt.err (!%p1879_p0)
}
  0x30   : > { %s2069_s21 = smov 64   ;;  %s2070_s22 = smov 4  }
  0x31   : > { %s2544_s3 = sld [smem:[#allocation28_spill]]  ;;  %s1894_s8 = scalar_lea.vmem %s174_s19, 16 }
  0x32   : > { %p1895_p11 = scmp.ne.s32.totalorder %s174_s19, %s1894_s8  ;;  %s1901_s9 = scalar_lea.vmem %s174_s19, 32 }
  0x33   : > { %p1902_p9 = scmp.lt.s32.totalorder %s174_s19, %s174_s19  ;;  %p1903_p3 = scmp.lt.s32.totalorder %s1901_s9, %s1894_s8 }
  0x34   : > { %p1897_p7 = pnand %p1895_p11, %p1859_p6 }
  0x35   : > { %p1904_p1 = por %p1903_p3, %p1902_p9 }
  0x36   : > { %p1898_p8 = pneg %p1897_p7 }
  0x37   : > { %1657 = dma.hbm_to_vmem [thread:$0]  (!%p2206_p4), %s2544_s3, 6144, %s160_s16, [#allocation10], %s2069_s21, %s2069_s21, %s2070_s22  }
  0x38   : > { %p1905_p10 = pnand %p1904_p1, %p1898_p8 }
  0x3a   : > { %1908 = shalt.err (!%p1905_p10)
}
  0x3b   : > { %s2545_s4 = sld [smem:[#allocation29_spill]]  ;;  %s37_s16 = sadd.s32 1, %s2055_s30 }
  0x3c   : > { %p38_p9 = scmp.ge.s32.totalorder %s37_s16, 2  ;;  %s40_s17 = sadd.s32 1, %s2059_s6 }
  0x3d   : > { %s1274_s21 = sshll.u32 %s2059_s6, 1  ;;  %p2546_p11 = scmp.ne.s32.totalorder %s2043_s28, %s2039_s27 }
  0x3e   : > { %p2547_p6 = scmp.eq.s32.totalorder %s2063_s7, 0  ;;  %s123_s23 = sadd.s32 1, %s2031_s26 }
  0x3f   : > { %s2580_s17 = smov (!%p38_p9, %s40_s17), %s2059_s6  ;;  %s2514_s0 = sand.u32 1, %s2043_s28  }
  0x40   : > { %p2237_p12 = por %p2547_p6, %p2546_p11  ;;  %p42_p0 = scmp.ge.s32.totalorder %s2580_s17, 3 }
  0x41   : > { %1660 = dma.hbm_to_vmem [thread:$0]  (!%p2206_p4), %s2545_s4, 16, %s174_s19, [#allocation10]  }
  0x42   : > { %s45_s19 = sadd.s32 %s2055_s30, %s1274_s21  ;;  %p1673_p4 = scmp.lt.s32.totalorder %s2063_s7, 6 }
  0x43   : > { %s2582_s16 = smov (%p38_p9, %s37_s16), 0  ;;  %s2584_s17 = smov (%p42_p0, %s2580_s17), 0 }
  0x44   : > { %2549 = sst [smem:[#allocation25_spill]] %s2582_s16  ;;  %s1280_s9 = sshll.u32 %s2514_s0, 8 }
  0x45   : > { %2550 = sst [smem:[#allocation26_spill]] %s2584_s17  ;;  %s1275_s15 = sshll.u32 %s2584_s17, 1 }
  0x46   : > { %s46_s8 = sld [smem:[#allocation4 + %s45_s19]]  ;;  %s50_s18 = ssub.s32 %s2059_s6, %s2584_s17 }
  0x47   : > { %s48_s21 = sadd.s32 %s1275_s15, %s2582_s16  ;;  %p121_p7 = scmp.eq.s32.totalorder %s50_s18, 0 }
  0x48   : > { %s49_s20 = sld [smem:[#allocation4 + %s48_s21]]  ;;  %p2260_p8 = pnand %p1673_p4, %p2237_p12 }
  0x49   : > { %s2265_s4 = scalar_select %p121_p7, %s2031_s26, %s123_s23  }
  0x4a   : > { %s1644_s30 = scalar_select %p2237_p12, [#allocation4], [#allocation13] }
  0x4b   : > { %2552 = sst [smem:[#allocation27_spill]] %s2265_s4  ;;  %s2586_s19 = smov (!%p2237_p12, %s45_s19), 0 }
  0x4c   : > { %s2588_s30 = smov (!%p1673_p4, %s1644_s30), [#allocation14]  ;;  %s2590_s19 = smov (!%p1673_p4, %s2586_s19), 0 }
  0x4d   : > { %s191_s0 = sld [smem:[%s2588_s30 + %s2590_s19]]  ;;  %s1639_s17 = smul.u32 192, %s2059_s6 }
  0x4e   : > { %s51_s15 = ssub.s32 %s46_s8, %s49_s20  ;;  %s188_s16 = scalar_lea.vmem [#allocation6], %s1280_s9 }
  0x4f   : > { %s52_s21 = sor.u32 %s51_s15, %s50_s18  ;;  %s201_s13 = sshll.u32 %s188_s16, 4  ;;  %s2281_s13 = int_to_ptr.vmem [resolvable:$true] %s201_s13 }
  0x50   : > { %p53_p3 = scmp.eq.s32.totalorder %s52_s21, 0  ;;  %s2553_s24 = sadd.s32 1, %s2043_s28 }
  0x51   : > { %s2554_s20 = sand.u32 1, %s2043_s28   ;;  %p1911_p10 = pneg %p2260_p8 }
  0x52   : > { %s2279_s23 = scalar_select %p53_p3, %s2043_s28, %s2553_s24  }
  0x53   : > { %s1283_s22 = sshll.u32 %s191_s0, 1  ;;  %s2290_s30 = scalar_lea.sflag [#allocation7], %s2554_s20 }
  0x54   : > { %s198_s4 = sadd.s32 %s1639_s17, %s1283_s22 }
  0x55   : > { %s1285_s26 = sshll.u32 %s198_s4, 6  ;;  %s1914_s4 = scalar_lea.hbm %s2507_s2, 36864 }
  0x56   : > { %s2286_s7 = scalar_lea.hbm %s2507_s2, %s1285_s26 }
  0x57   : > { %s1909_s16 = scalar_lea.hbm %s2286_s7, 4096  ;;  %p1915_p6 = scmp.lt.s32.totalorder %s2286_s7, %s2507_s2 }
  0x58   : > { %p1910_p1 = scmp.ne.s32.totalorder %s2286_s7, %s1909_s16  ;;  %p1916_p12 = scmp.lt.s32.totalorder %s1914_s4, %s1909_s16 }
  0x5a   : > { %p1912_p9 = pnand %p1911_p10, %p1910_p1  ;;  %p1917_p4 = por %p1916_p12, %p1915_p6 }
  0x5c   : > { %p1913_p11 = pneg %p1912_p9 }
  0x5e   : > { %p1918_p0 = pnand %p1917_p4, %p1913_p11 }
  0x60   : > { %1921 = shalt.err (!%p1918_p0)
}
  0x61   : > { %s1922_s26 = scalar_lea.vmem %s2281_s13, 4096  ;;  %s2071_s12 = smov [#allocation6]  }
  0x62   : > { %p1923_p7 = scmp.ne.s32.totalorder %s2281_s13, %s1922_s26  ;;  %s1927_s0 = sshll.u32 %s2071_s12, 4  ;;  %s1928_s0 = int_to_ptr.vmem [resolvable:$false] %s1927_s0 }
  0x63   : > { %s1929_s8 = scalar_lea.vmem %s1928_s0, 8192  ;;  %p1930_p9 = scmp.lt.s32.totalorder %s2281_s13, %s1928_s0 }
  0x64   : > { %p1925_p3 = pnand %p1923_p7, %p1911_p10  ;;  %p1931_p2 = scmp.lt.s32.totalorder %s1929_s8, %s1922_s26 }
  0x66   : > { %p1926_p1 = pneg %p1925_p3  ;;  %p1932_p5 = por %p1931_p2, %p1930_p9 }
  0x68   : > { %p1933_p13 = pnand %p1932_p5, %p1926_p1 }
  0x6a   : > { %1936 = shalt.err (!%p1933_p13)
}
  0x6b   : > { %s2072_s9 = smov 384   ;;  %s2073_s18 = smov 128  }
  0x6c   : > { %s2074_s15 = smov 8   ;;  %p2555_p10 = scmp.ne.s32.totalorder %s2542_s14, 0 }
  0x6d   : > { %1666 = dma.hbm_to_vmem [thread:$0]  (!%p2260_p8), %s2286_s7, 4096, %s2281_s13, %s2290_s30, %s2072_s9, %s2073_s18, %s2074_s15  }
  0x6e   : > { %213 = sbr.rel (%p2555_p10) target bundleno = 515 (0x203), region = 32  ;;  %s215_s21 = sand.u32 (!%p2555_p10), 1, %s2039_s27  }
  0x6f   : > { %s1287_s22 = sshll.u32 (!%p2555_p10), %s215_s21, 8  ;;  %s216_s20 = scalar_lea.sflag (!%p2555_p10), [#allocation7], %s215_s21 }
  0x70   : > { %s2314_s16 = scalar_lea.vmem (!%p2555_p10), [#allocation6], %s1287_s22  ;;  %p2556_p2 = scmp.ne.s32.totalorder (!%p2555_p10), %s2537_s11, 0 }
  0x73   : > { %2010 = dma.done.wait (%p2556_p2), %s216_s20, 4096  }
  0x74   : > { %2012 = vsyncadd (%p2556_p2), %s216_s20, 4294963200  ;;  %p2557_p5 = scmp.ne.s32.totalorder %s2536_s10, 0 }
  0x76   : > { %2014 = dma.done.wait (%p2557_p5), [#allocation10], 6160  }
  0x77   : > { %2016 = vsyncadd (%p2557_p5), [#allocation10], 4294961136  ;;  %s247_s3 = sand.u32 1, %s2027_s25   ;;  %p1291_p13 = scmp.ne.s32.totalorder %s2047_s1, 0 }
  0x78   : > { %s1290_s7 = sshll.u32 %s247_s3, 7 }
  0x79   : > { %s2327_s13 = scalar_lea.vmem [#allocation12], %s1290_s7  ;;  %260 = sbr.rel (%p1291_p13) target bundleno = 143 (0x8f), region = 48 }
  0x7e   : > { %v2075_v0 = vmov 0.0  }
  0x7f   : > { %261 = vst [vmem:[#allocation2 + $0xb0] sm:$0xff] %v2075_v0  ;;  %262 = vst [vmem:[#allocation2] sm:$0xff] %v2075_v0 }
  0x80   : > { %263 = vst [vmem:[#allocation2 + $0xd8] sm:$0xff] %v2075_v0  ;;  %264 = vst [vmem:[#allocation2 + $0x18] sm:$0xff] %v2075_v0 }
  0x81   : > { %265 = vst [vmem:[#allocation2 + $0x50] sm:$0xff] %v2075_v0  ;;  %266 = vst [vmem:[#allocation2 + $0x68] sm:$0xff] %v2075_v0 }
  0x82   : > { %267 = vst [vmem:[#allocation2 + $0x30] sm:$0xff] %v2075_v0  ;;  %268 = vst [vmem:[#allocation2 + $0x48] sm:$0xff] %v2075_v0 }
  0x83   : > { %269 = vst [vmem:[#allocation2 + $0x80] sm:$0xff] %v2075_v0  ;;  %270 = vst [vmem:[#allocation2 + $0x88] sm:$0xff] %v2075_v0 }
  0x84   : > { %271 = vst [vmem:[#allocation2 + $0xe8] sm:$0xff] %v2075_v0  ;;  %272 = vst [vmem:[#allocation2 + $0xb8] sm:$0xff] %v2075_v0 }
  0x85   : > { %273 = vst [vmem:[#allocation2 + $0x60] sm:$0xff] %v2075_v0  ;;  %274 = vst [vmem:[#allocation2 + $0xf0] sm:$0xff] %v2075_v0 }
  0x86   : > { %275 = vst [vmem:[#allocation2 + $0x8] sm:$0xff] %v2075_v0  ;;  %276 = vst [vmem:[#allocation2 + $0x78] sm:$0xff] %v2075_v0 }
  0x87   : > { %277 = vst [vmem:[#allocation2 + $0x38] sm:$0xff] %v2075_v0  ;;  %278 = vst [vmem:[#allocation2 + $0x58] sm:$0xff] %v2075_v0 }
  0x88   : > { %279 = vst [vmem:[#allocation2 + $0x40] sm:$0xff] %v2075_v0  ;;  %280 = vst [vmem:[#allocation2 + $0xc8] sm:$0xff] %v2075_v0 }
  0x89   : > { %281 = vst [vmem:[#allocation2 + $0xe0] sm:$0xff] %v2075_v0  ;;  %282 = vst [vmem:[#allocation2 + $0x90] sm:$0xff] %v2075_v0 }
  0x8a   : > { %283 = vst [vmem:[#allocation2 + $0x70] sm:$0xff] %v2075_v0  ;;  %284 = vst [vmem:[#allocation2 + $0xc0] sm:$0xff] %v2075_v0 }
  0x8b   : > { %285 = vst [vmem:[#allocation2 + $0xa8] sm:$0xff] %v2075_v0  ;;  %286 = vst [vmem:[#allocation2 + $0xd0] sm:$0xff] %v2075_v0 }
  0x8c   : > { %287 = vst [vmem:[#allocation2 + $0x10] sm:$0xff] %v2075_v0  ;;  %288 = vst [vmem:[#allocation2 + $0x28] sm:$0xff] %v2075_v0 }
  0x8d   : > { %289 = vst [vmem:[#allocation2 + $0xa0] sm:$0xff] %v2075_v0  ;;  %290 = vst [vmem:[#allocation2 + $0xf8] sm:$0xff] %v2075_v0 }
  0x8e   : > { %291 = vst [vmem:[#allocation2 + $0x20] sm:$0xff] %v2075_v0  ;;  %292 = vst [vmem:[#allocation2 + $0x98] sm:$0xff] %v2075_v0 }
  0x8f PF: > { %s293_s10 = sld [smem:[#allocation5 + %s2051_s29]] }
  0x95   : > { %p1292_p8 = scmp.ge.s32.totalorder %s2047_s1, %s293_s10 }
  0x96   : > { %s1293_s11 = sshll.u32 (!%p1292_p8), %s2051_s29, 1 }
  0x97   : > { %297 = sbr.rel (%p1292_p8) target bundleno = 455 (0x1c7), region = 52  ;;  %s299_s14 = sadd.s32 (!%p1292_p8), %s2047_s1, %s1293_s11 }
  0x98   : > { %s300_s30 = sld [smem:[#allocation4 + %s299_s14]] (!%p1292_p8) }
  0x9c   : > { %v1795_v1 = vld [vmem:[%s2314_s16 + $0x4] ss:$8 sps:$4 sm:$0xff]   ;;  %v1793_v19 = vld [vmem:[%s2314_s16] ss:$8 sps:$4 sm:$0xff]   ;;  %v1799_v21 = vld [vmem:[%s2314_s16 + $0x14] ss:$8 sps:$4 sm:$0xff]  }
  0x9d   : > { %v1798_v2 = vld [vmem:[%s2314_s16 + $0x84] ss:$8 sps:$4 sm:$0xff]   ;;  %690 = vmatprep.mubr.bf16.mxu0 %v1795_v1  ;;  %v1796_v20 = vld [vmem:[%s2314_s16 + $0x80] ss:$8 sps:$4 sm:$0xff]   ;;  %v1801_v22 = vld [vmem:[%s2314_s16 + $0x94] ss:$8 sps:$4 sm:$0xff]  }
  0x9e   : > { %754 = vmatprep.mubr.bf16.mxu1 %v1798_v2  ;;  %s1294_s24 = sshll.u32 %s300_s30, 8  ;;  %v1803_v23 = vld [vmem:[%s2314_s16 + $0x10] ss:$8 sps:$4 sm:$0xff]   ;;  %v1805_v25 = vld [vmem:[%s2314_s16 + $0x24] ss:$8 sps:$4 sm:$0xff]  }
  0x9f   : > { %s366_s17 = sshra.s32 %s1294_s24, 3  ;;  %v1804_v24 = vld [vmem:[%s2314_s16 + $0x90] ss:$8 sps:$4 sm:$0xff]   ;;  %v1807_v26 = vld [vmem:[%s2314_s16 + $0xa4] ss:$8 sps:$4 sm:$0xff]  }
  0xa0   : > { %s1295_s4 = sshll.u32 %s366_s17, 2  ;;  %v1809_v27 = vld [vmem:[%s2314_s16 + $0x20] ss:$8 sps:$4 sm:$0xff]   ;;  %v1811_v29 = vld [vmem:[%s2314_s16 + $0x34] ss:$8 sps:$4 sm:$0xff]  }
  0xa1   : > { %s2336_s19 = scalar_lea.vmem [#allocation9], %s1295_s4  ;;  %v1810_v28 = vld [vmem:[%s2314_s16 + $0xa0] ss:$8 sps:$4 sm:$0xff]   ;;  %v1813_v30 = vld [vmem:[%s2314_s16 + $0xb4] ss:$8 sps:$4 sm:$0xff]  }
  0xa2   : > { %v1777_v3 = vld [vmem:[%s2336_s19 + $0x78] sm:$0xff]   ;;  %v1779_v5 = vld [vmem:[%s2336_s19 + $0x70] sm:$0xff]   ;;  %v1781_v7 = vld [vmem:[%s2336_s19 + $0x68] sm:$0xff]  }
  0xa3   : > { %v1778_v4 = vld [vmem:[%s2336_s19 + $0x38] sm:$0xff]   ;;  %1511 = vmatprep.subr.bf16.mxu0 %v1777_v3  ;;  %1623 = vmatprep.subr.bf16.mxu1 %v1777_v3  ;;  %v1780_v6 = vld [vmem:[%s2336_s19 + $0x30] sm:$0xff]   ;;  %v1782_v8 = vld [vmem:[%s2336_s19 + $0x28] sm:$0xff]  }
  0xa4   : > { %1512 = vmatpush3.bf16.msra.mxu0 %v1778_v4  ;;  %1631 = vmatpush3.bf16.msra.mxu1 %v1778_v4  ;;  %v1783_v9 = vld [vmem:[%s2336_s19 + $0x60] sm:$0xff]   ;;  %v1785_v11 = vld [vmem:[%s2336_s19 + $0x58] sm:$0xff]   ;;  %v1787_v13 = vld [vmem:[%s2336_s19 + $0x50] sm:$0xff]  }
  0xa5   : > { %1513 = vmatprep.subr.bf16.mxu0 %v1779_v5  ;;  %1624 = vmatprep.subr.bf16.mxu1 %v1779_v5  ;;  %v1784_v10 = vld [vmem:[%s2336_s19 + $0x20] sm:$0xff]   ;;  %v1786_v12 = vld [vmem:[%s2336_s19 + $0x18] sm:$0xff]   ;;  %v1788_v14 = vld [vmem:[%s2336_s19 + $0x10] sm:$0xff]  }
  0xa6   : > { %v1789_v15 = vld [vmem:[%s2336_s19 + $0x48] sm:$0xff]   ;;  %v1791_v17 = vld [vmem:[%s2336_s19 + $0x40] sm:$0xff]   ;;  %v1815_v31 = vld [vmem:[%s2314_s16 + $0x30] ss:$8 sps:$4 sm:$0xff]  }
  0xa7   : > { %v1790_v16 = vld [vmem:[%s2336_s19 + $0x8] sm:$0xff]   ;;  %v1792_v18 = vld [vmem:[%s2336_s19] sm:$0xff]   ;;  %v1816_v32 = vld [vmem:[%s2314_s16 + $0xb0] ss:$8 sps:$4 sm:$0xff]  }
  0xa8   : > { %1514 = vmatpush3.bf16.msra.mxu0 %v1780_v6  ;;  %1632 = vmatpush3.bf16.msra.mxu1 %v1780_v6  ;;  %v1817_v33 = vld [vmem:[%s2314_s16 + $0x44] ss:$8 sps:$4 sm:$0xff]   ;;  %v1821_v35 = vld [vmem:[%s2314_s16 + $0x40] ss:$8 sps:$4 sm:$0xff]   ;;  %v1823_v37 = vld [vmem:[%s2314_s16 + $0x54] ss:$8 sps:$4 sm:$0xff]  }
  0xa9   : > { %1515 = vmatprep.subr.bf16.mxu0 %v1781_v7  ;;  %1625 = vmatprep.subr.bf16.mxu1 %v1781_v7  ;;  %v1819_v34 = vld [vmem:[%s2314_s16 + $0xc4] ss:$8 sps:$4 sm:$0xff]   ;;  %v1822_v36 = vld [vmem:[%s2314_s16 + $0xc0] ss:$8 sps:$4 sm:$0xff]   ;;  %v1825_v38 = vld [vmem:[%s2314_s16 + $0xd4] ss:$8 sps:$4 sm:$0xff]  }
  0xaa   : > { %v1827_v39 = vld [vmem:[%s2314_s16 + $0x50] ss:$8 sps:$4 sm:$0xff]   ;;  %v1829_v41 = vld [vmem:[%s2314_s16 + $0x64] ss:$8 sps:$4 sm:$0xff]   ;;  %v1833_v43 = vld [vmem:[%s2314_s16 + $0x60] ss:$8 sps:$4 sm:$0xff]  }
  0xab   : > { %v1828_v40 = vld [vmem:[%s2314_s16 + $0xd0] ss:$8 sps:$4 sm:$0xff]   ;;  %v1831_v42 = vld [vmem:[%s2314_s16 + $0xe4] ss:$8 sps:$4 sm:$0xff]   ;;  %v1834_v44 = vld [vmem:[%s2314_s16 + $0xe0] ss:$8 sps:$4 sm:$0xff]  }
  0xac   : > { %1516 = vmatpush3.bf16.msra.mxu0 %v1782_v8  ;;  %1633 = vmatpush3.bf16.msra.mxu1 %v1782_v8  ;;  %v1835_v45 = vld [vmem:[%s2314_s16 + $0x74] ss:$8 sps:$4 sm:$0xff]   ;;  %v1839_v47 = vld [vmem:[%s2314_s16 + $0x70] ss:$8 sps:$4 sm:$0xff]   ;;  %v303_v61 = vld [vmem:[#allocation2] sm:$0xff] }
  0xad   : > { %1517 = vmatprep.subr.bf16.mxu0 %v1783_v9  ;;  %1626 = vmatprep.subr.bf16.mxu1 %v1783_v9  ;;  %v1837_v46 = vld [vmem:[%s2314_s16 + $0xf4] ss:$8 sps:$4 sm:$0xff]   ;;  %v1840_v48 = vld [vmem:[%s2314_s16 + $0xf0] ss:$8 sps:$4 sm:$0xff]   ;;  %v320_v9 = vld [vmem:[#allocation2 + $0x40] sm:$0xff] }
  0xae   : > { %v302_v51 = vld [vmem:[#allocation2 + $0xb0] sm:$0xff]  ;;  %v318_v53 = vld [vmem:[#allocation2 + $0x38] sm:$0xff] }
  0xaf   : > { %v319_v63 = vld [vmem:[#allocation2 + $0x58] sm:$0xff] }
  0xb0   : > { %1518 = vmatpush3.bf16.msra.mxu0 %v1784_v10  ;;  %1634 = vmatpush3.bf16.msra.mxu1 %v1784_v10  ;;  %v304_v7 = vld [vmem:[#allocation2 + $0xd8] sm:$0xff] }
  0xb1   : > { %1519 = vmatprep.subr.bf16.mxu0 %v1785_v11  ;;  %1627 = vmatprep.subr.bf16.mxu1 %v1785_v11 }
  0xb4   : > { %1520 = vmatpush3.bf16.msra.mxu0 %v1786_v12  ;;  %1635 = vmatpush3.bf16.msra.mxu1 %v1786_v12 }
  0xb5   : > { %1521 = vmatprep.subr.bf16.mxu0 %v1787_v13  ;;  %1628 = vmatprep.subr.bf16.mxu1 %v1787_v13 }
  0xb8   : > { %1522 = vmatpush3.bf16.msra.mxu0 %v1788_v14  ;;  %1636 = vmatpush3.bf16.msra.mxu1 %v1788_v14 }
  0xb9   : > { %1523 = vmatprep.subr.bf16.mxu0 %v1789_v15  ;;  %1629 = vmatprep.subr.bf16.mxu1 %v1789_v15 }
  0xbc   : > { %1524 = vmatpush3.bf16.msra.mxu0 %v1790_v16  ;;  %1637 = vmatpush3.bf16.msra.mxu1 %v1790_v16 }
  0xbd   : > { %1525 = vmatprep.subr.bf16.mxu0 %v1791_v17  ;;  %1630 = vmatprep.subr.bf16.mxu1 %v1791_v17  ;;  %v305_v17 = vld [vmem:[#allocation2 + $0x18] sm:$0xff] }
  0xc0   : > { %1526 = vmatpush3.bf16.msra.mxu0 %v1792_v18  ;;  %1638 = vmatpush3.bf16.msra.mxu1 %v1792_v18 }
  0xc3   : > { %691 = vmatmul.mubr.bf16.vlgmr.msra.gmra.mxu0 %v1793_v19  ;;  %755 = vmatmul.mubr.bf16.vlgmr.msra.gmra.mxu1 %v1796_v20  ;;  %v321_v19 = vld [vmem:[#allocation2 + $0xc8] sm:$0xff] }
  0xc4   : > { %698 = vmatprep.mubr.bf16.mxu0 %v1799_v21  ;;  %762 = vmatprep.mubr.bf16.mxu1 %v1801_v22 }
  0xcb   : > { %699 = vmatmul.mubr.bf16.gmra.mxu0 %v1803_v23  ;;  %763 = vmatmul.mubr.bf16.gmra.mxu1 %v1804_v24 }
  0xcc   : > { %706 = vmatprep.mubr.bf16.mxu0 %v1805_v25  ;;  %770 = vmatprep.mubr.bf16.mxu1 %v1807_v26 }
  0xd3   : > { %707 = vmatmul.mubr.bf16.gmra.mxu0 %v1809_v27  ;;  %771 = vmatmul.mubr.bf16.gmra.mxu1 %v1810_v28  ;;  %v306_v27 = vld [vmem:[#allocation2 + $0x50] sm:$0xff] }
  0xd4   : > { %714 = vmatprep.mubr.bf16.mxu0 %v1811_v29  ;;  %778 = vmatprep.mubr.bf16.mxu1 %v1813_v30  ;;  %v322_v29 = vld [vmem:[#allocation2 + $0xe0] sm:$0xff] }
  0xdb   : > { %715 = vmatmul.mubr.bf16.gmra.mxu0 %v1815_v31  ;;  %779 = vmatmul.mubr.bf16.gmra.mxu1 %v1816_v32 }
  0xdc   : > { %722 = vmatprep.mubr.bf16.mxu0 %v1817_v33  ;;  %786 = vmatprep.mubr.bf16.mxu1 %v1819_v34 }
  0xe3   : > { %723 = vmatmul.mubr.bf16.gmra.mxu0 %v1821_v35  ;;  %787 = vmatmul.mubr.bf16.gmra.mxu1 %v1822_v36 }
  0xe4   : > { %730 = vmatprep.mubr.bf16.mxu0 %v1823_v37  ;;  %794 = vmatprep.mubr.bf16.mxu1 %v1825_v38  ;;  %v307_v37 = vld [vmem:[#allocation2 + $0x68] sm:$0xff] }
  0xeb   : > { %731 = vmatmul.mubr.bf16.gmra.mxu0 %v1827_v39  ;;  %795 = vmatmul.mubr.bf16.gmra.mxu1 %v1828_v40  ;;  %v323_v39 = vld [vmem:[#allocation2 + $0x90] sm:$0xff] }
  0xec   : > { %738 = vmatprep.mubr.bf16.mxu0 %v1829_v41  ;;  %802 = vmatprep.mubr.bf16.mxu1 %v1831_v42 }
  0xf3   : > { %739 = vmatmul.mubr.bf16.gmra.mxu0 %v1833_v43  ;;  %803 = vmatmul.mubr.bf16.gmra.mxu1 %v1834_v44 }
  0xf4   : > { %746 = vmatprep.mubr.bf16.mxu0 %v1835_v45  ;;  %810 = vmatprep.mubr.bf16.mxu1 %v1837_v46 }
  0xfb   : > { %747 = vmatmul.mubr.bf16.gmra.mxu0 %v1839_v47  ;;  %811 = vmatmul.mubr.bf16.gmra.mxu1 %v1840_v48  ;;  %v308_v47 = vld [vmem:[#allocation2 + $0x30] sm:$0xff] }
 0x183   : > { %v1527_v49 = vpop.f32.mrf.mxu0  ;;  %v1575_v50 = vpop.f32.mrf.mxu1 }
 0x185   : > { %v1528_v52 = vpop.f32.mrf.mxu0  ;;  %v1576_v54 = vpop.f32.mrf.mxu1 }
 0x186   : > { %v1529_v55 = vadd.f32 %v1528_v52, %v1527_v49  ;;  %v1577_v56 = vadd.f32 %v1576_v54, %v1575_v50  ;;  %v324_v49 = vld [vmem:[#allocation2 + $0x70] sm:$0xff] }
 0x187   : > { %v1530_v57 = vpop.f32.mrf.mxu0  ;;  %v1578_v58 = vpop.f32.mrf.mxu1 }
 0x188   : > { %v819_v59 = vadd.f32 %v1529_v55, %v302_v51  ;;  %v835_v60 = vadd.f32 %v1577_v56, %v318_v53 }
 0x189   : > { %v1531_v62 = vpop.f32.mrf.mxu0  ;;  %v1579_v0 = vpop.f32.mrf.mxu1 }
 0x18a   : > { %851 = vst [vmem:[#allocation2 + $0xb0] sm:$0xff] %v819_v59  ;;  %867 = vst [vmem:[#allocation2 + $0x38] sm:$0xff] %v835_v60  ;;  %v1532_v1 = vadd.f32 %v1531_v62, %v1530_v57  ;;  %v1580_v2 = vadd.f32 %v1579_v0, %v1578_v58  ;;  %v309_v57 = vld [vmem:[#allocation2 + $0x48] sm:$0xff]  ;;  %v325_v59 = vld [vmem:[#allocation2 + $0xc0] sm:$0xff] }
 0x18b   : > { %v1533_v3 = vpop.f32.mrf.mxu0  ;;  %v1581_v4 = vpop.f32.mrf.mxu1 }
 0x18c   : > { %v820_v5 = vadd.f32 %v1532_v1, %v303_v61  ;;  %v836_v6 = vadd.f32 %v1580_v2, %v319_v63 }
 0x18d   : > { %v1534_v8 = vpop.f32.mrf.mxu0  ;;  %v1582_v10 = vpop.f32.mrf.mxu1 }
 0x18e   : > { %852 = vst [vmem:[#allocation2] sm:$0xff] %v820_v5  ;;  %868 = vst [vmem:[#allocation2 + $0x58] sm:$0xff] %v836_v6  ;;  %v1535_v11 = vadd.f32 %v1534_v8, %v1533_v3  ;;  %v1583_v12 = vadd.f32 %v1582_v10, %v1581_v4  ;;  %v310_v3 = vld [vmem:[#allocation2 + $0x80] sm:$0xff]  ;;  %v326_v5 = vld [vmem:[#allocation2 + $0xa8] sm:$0xff] }
 0x18f   : > { %v1536_v13 = vpop.f32.mrf.mxu0  ;;  %v1584_v14 = vpop.f32.mrf.mxu1 }
 0x190   : > { %v821_v15 = vadd.f32 %v1535_v11, %v304_v7  ;;  %v837_v16 = vadd.f32 %v1583_v12, %v320_v9 }
 0x191   : > { %v1537_v18 = vpop.f32.mrf.mxu0  ;;  %v1585_v20 = vpop.f32.mrf.mxu1 }
 0x192   : > { %853 = vst [vmem:[#allocation2 + $0xd8] sm:$0xff] %v821_v15  ;;  %869 = vst [vmem:[#allocation2 + $0x40] sm:$0xff] %v837_v16  ;;  %v1538_v21 = vadd.f32 %v1537_v18, %v1536_v13  ;;  %v1586_v22 = vadd.f32 %v1585_v20, %v1584_v14  ;;  %v311_v13 = vld [vmem:[#allocation2 + $0x88] sm:$0xff]  ;;  %v327_v15 = vld [vmem:[#allocation2 + $0xd0] sm:$0xff] }
 0x193   : > { %v1539_v23 = vpop.f32.mrf.mxu0  ;;  %v1587_v24 = vpop.f32.mrf.mxu1 }
 0x194   : > { %v822_v25 = vadd.f32 %v1538_v21, %v305_v17  ;;  %v838_v26 = vadd.f32 %v1586_v22, %v321_v19 }
 0x195   : > { %v1540_v28 = vpop.f32.mrf.mxu0  ;;  %v1588_v30 = vpop.f32.mrf.mxu1 }
 0x196   : > { %854 = vst [vmem:[#allocation2 + $0x18] sm:$0xff] %v822_v25  ;;  %870 = vst [vmem:[#allocation2 + $0xc8] sm:$0xff] %v838_v26  ;;  %v1541_v31 = vadd.f32 %v1540_v28, %v1539_v23  ;;  %v1589_v32 = vadd.f32 %v1588_v30, %v1587_v24  ;;  %v312_v23 = vld [vmem:[#allocation2 + $0xe8] sm:$0xff]  ;;  %v328_v25 = vld [vmem:[#allocation2 + $0x10] sm:$0xff] }
 0x197   : > { %v1542_v33 = vpop.f32.mrf.mxu0  ;;  %v1590_v34 = vpop.f32.mrf.mxu1 }
 0x198   : > { %v823_v35 = vadd.f32 %v1541_v31, %v306_v27  ;;  %v839_v36 = vadd.f32 %v1589_v32, %v322_v29 }
 0x199   : > { %v1543_v38 = vpop.f32.mrf.mxu0  ;;  %v1591_v40 = vpop.f32.mrf.mxu1 }
 0x19a   : > { %855 = vst [vmem:[#allocation2 + $0x50] sm:$0xff] %v823_v35  ;;  %871 = vst [vmem:[#allocation2 + $0xe0] sm:$0xff] %v839_v36  ;;  %v1544_v41 = vadd.f32 %v1543_v38, %v1542_v33  ;;  %v1592_v42 = vadd.f32 %v1591_v40, %v1590_v34  ;;  %v313_v33 = vld [vmem:[#allocation2 + $0xb8] sm:$0xff]  ;;  %v329_v35 = vld [vmem:[#allocation2 + $0x28] sm:$0xff] }
 0x19b   : > { %v1545_v43 = vpop.f32.mrf.mxu0  ;;  %v1593_v44 = vpop.f32.mrf.mxu1 }
 0x19c   : > { %v824_v45 = vadd.f32 %v1544_v41, %v307_v37  ;;  %v840_v46 = vadd.f32 %v1592_v42, %v323_v39 }
 0x19d   : > { %v1546_v48 = vpop.f32.mrf.mxu0  ;;  %v1594_v50 = vpop.f32.mrf.mxu1 }
 0x19e   : > { %856 = vst [vmem:[#allocation2 + $0x68] sm:$0xff] %v824_v45  ;;  %872 = vst [vmem:[#allocation2 + $0x90] sm:$0xff] %v840_v46  ;;  %v1547_v51 = vadd.f32 %v1546_v48, %v1545_v43  ;;  %v1595_v52 = vadd.f32 %v1594_v50, %v1593_v44  ;;  %v314_v43 = vld [vmem:[#allocation2 + $0x60] sm:$0xff] }
 0x19f   : > { %v1548_v53 = vpop.f32.mrf.mxu0  ;;  %v1596_v54 = vpop.f32.mrf.mxu1  ;;  %v330_v45 = vld [vmem:[#allocation2 + $0xa0] sm:$0xff] }
 0x1a0   : > { %v825_v55 = vadd.f32 %v1547_v51, %v308_v47  ;;  %v841_v56 = vadd.f32 %v1595_v52, %v324_v49 }
 0x1a1   : > { %v1549_v58 = vpop.f32.mrf.mxu0  ;;  %v1597_v60 = vpop.f32.mrf.mxu1 }
 0x1a2   : > { %857 = vst [vmem:[#allocation2 + $0x30] sm:$0xff] %v825_v55  ;;  %873 = vst [vmem:[#allocation2 + $0x70] sm:$0xff] %v841_v56  ;;  %v1550_v61 = vadd.f32 %v1549_v58, %v1548_v53  ;;  %v1598_v62 = vadd.f32 %v1597_v60, %v1596_v54  ;;  %v315_v53 = vld [vmem:[#allocation2 + $0xf0] sm:$0xff]  ;;  %v331_v55 = vld [vmem:[#allocation2 + $0xf8] sm:$0xff] }
 0x1a3   : > { %v1551_v63 = vpop.f32.mrf.mxu0  ;;  %v1599_v0 = vpop.f32.mrf.mxu1 }
 0x1a4   : > { %v826_v1 = vadd.f32 %v1550_v61, %v309_v57  ;;  %v842_v2 = vadd.f32 %v1598_v62, %v325_v59 }
 0x1a5   : > { %v1552_v4 = vpop.f32.mrf.mxu0  ;;  %v1600_v6 = vpop.f32.mrf.mxu1 }
 0x1a6   : > { %858 = vst [vmem:[#allocation2 + $0x48] sm:$0xff] %v826_v1  ;;  %874 = vst [vmem:[#allocation2 + $0xc0] sm:$0xff] %v842_v2  ;;  %v1553_v7 = vadd.f32 %v1552_v4, %v1551_v63  ;;  %v1601_v8 = vadd.f32 %v1600_v6, %v1599_v0  ;;  %v316_v63 = vld [vmem:[#allocation2 + $0x8] sm:$0xff]  ;;  %v332_v1 = vld [vmem:[#allocation2 + $0x20] sm:$0xff] }
 0x1a7   : > { %v1554_v9 = vpop.f32.mrf.mxu0  ;;  %v1602_v10 = vpop.f32.mrf.mxu1 }
 0x1a8   : > { %v827_v11 = vadd.f32 %v1553_v7, %v310_v3  ;;  %v843_v12 = vadd.f32 %v1601_v8, %v326_v5 }
 0x1a9   : > { %v1555_v14 = vpop.f32.mrf.mxu0  ;;  %v1603_v16 = vpop.f32.mrf.mxu1 }
 0x1aa   : > { %859 = vst [vmem:[#allocation2 + $0x80] sm:$0xff] %v827_v11  ;;  %875 = vst [vmem:[#allocation2 + $0xa8] sm:$0xff] %v843_v12  ;;  %v1556_v17 = vadd.f32 %v1555_v14, %v1554_v9  ;;  %v1604_v18 = vadd.f32 %v1603_v16, %v1602_v10  ;;  %v317_v9 = vld [vmem:[#allocation2 + $0x78] sm:$0xff] }
 0x1ab   : > { %v1557_v19 = vpop.f32.mrf.mxu0  ;;  %v1605_v20 = vpop.f32.mrf.mxu1  ;;  %v333_v11 = vld [vmem:[#allocation2 + $0x98] sm:$0xff] }
 0x1ac   : > { %v828_v21 = vadd.f32 %v1556_v17, %v311_v13  ;;  %v844_v22 = vadd.f32 %v1604_v18, %v327_v15 }
 0x1ad   : > { %v1558_v24 = vpop.f32.mrf.mxu0  ;;  %v1606_v26 = vpop.f32.mrf.mxu1 }
 0x1ae   : > { %860 = vst [vmem:[#allocation2 + $0x88] sm:$0xff] %v828_v21  ;;  %876 = vst [vmem:[#allocation2 + $0xd0] sm:$0xff] %v844_v22  ;;  %v1559_v27 = vadd.f32 %v1558_v24, %v1557_v19  ;;  %v1607_v28 = vadd.f32 %v1606_v26, %v1605_v20 }
 0x1af   : > { %v1560_v29 = vpop.f32.mrf.mxu0  ;;  %v1608_v30 = vpop.f32.mrf.mxu1 }
 0x1b0   : > { %v829_v31 = vadd.f32 %v1559_v27, %v312_v23  ;;  %v845_v32 = vadd.f32 %v1607_v28, %v328_v25 }
 0x1b1   : > { %v1561_v34 = vpop.f32.mrf.mxu0  ;;  %v1609_v36 = vpop.f32.mrf.mxu1 }
 0x1b2   : > { %861 = vst [vmem:[#allocation2 + $0xe8] sm:$0xff] %v829_v31  ;;  %877 = vst [vmem:[#allocation2 + $0x10] sm:$0xff] %v845_v32  ;;  %v1562_v37 = vadd.f32 %v1561_v34, %v1560_v29  ;;  %v1610_v38 = vadd.f32 %v1609_v36, %v1608_v30 }
 0x1b3   : > { %v1563_v39 = vpop.f32.mrf.mxu0  ;;  %v1611_v40 = vpop.f32.mrf.mxu1 }
 0x1b4   : > { %v830_v41 = vadd.f32 %v1562_v37, %v313_v33  ;;  %v846_v42 = vadd.f32 %v1610_v38, %v329_v35 }
 0x1b5   : > { %v1564_v44 = vpop.f32.mrf.mxu0  ;;  %v1612_v46 = vpop.f32.mrf.mxu1 }
 0x1b6   : > { %862 = vst [vmem:[#allocation2 + $0xb8] sm:$0xff] %v830_v41  ;;  %878 = vst [vmem:[#allocation2 + $0x28] sm:$0xff] %v846_v42  ;;  %v1565_v47 = vadd.f32 %v1564_v44, %v1563_v39  ;;  %v1613_v48 = vadd.f32 %v1612_v46, %v1611_v40 }
 0x1b7   : > { %v1566_v49 = vpop.f32.mrf.mxu0  ;;  %v1614_v50 = vpop.f32.mrf.mxu1 }
 0x1b8   : > { %v831_v51 = vadd.f32 %v1565_v47, %v314_v43  ;;  %v847_v52 = vadd.f32 %v1613_v48, %v330_v45 }
 0x1b9   : > { %v1567_v54 = vpop.f32.mrf.mxu0  ;;  %v1615_v56 = vpop.f32.mrf.mxu1 }
 0x1ba   : > { %863 = vst [vmem:[#allocation2 + $0x60] sm:$0xff] %v831_v51  ;;  %879 = vst [vmem:[#allocation2 + $0xa0] sm:$0xff] %v847_v52  ;;  %v1568_v57 = vadd.f32 %v1567_v54, %v1566_v49  ;;  %v1616_v58 = vadd.f32 %v1615_v56, %v1614_v50 }
 0x1bb   : > { %v1569_v59 = vpop.f32.mrf.mxu0  ;;  %v1617_v60 = vpop.f32.mrf.mxu1 }
 0x1bc   : > { %v832_v61 = vadd.f32 %v1568_v57, %v315_v53  ;;  %v848_v62 = vadd.f32 %v1616_v58, %v331_v55 }
 0x1bd   : > { %v1570_v0 = vpop.f32.mrf.mxu0  ;;  %v1618_v2 = vpop.f32.mrf.mxu1 }
 0x1be   : > { %864 = vst [vmem:[#allocation2 + $0xf0] sm:$0xff] %v832_v61  ;;  %880 = vst [vmem:[#allocation2 + $0xf8] sm:$0xff] %v848_v62  ;;  %v1571_v3 = vadd.f32 %v1570_v0, %v1569_v59  ;;  %v1619_v4 = vadd.f32 %v1618_v2, %v1617_v60 }
 0x1bf   : > { %v1572_v5 = vpop.f32.mrf.mxu0  ;;  %v1620_v6 = vpop.f32.mrf.mxu1 }
 0x1c0   : > { %v833_v7 = vadd.f32 %v1571_v3, %v316_v63  ;;  %v849_v8 = vadd.f32 %v1619_v4, %v332_v1 }
 0x1c1   : > { %v1573_v10 = vpop.f32.mrf.mxu0  ;;  %v1621_v12 = vpop.f32.mrf.mxu1 }
 0x1c2   : > { %865 = vst [vmem:[#allocation2 + $0x8] sm:$0xff] %v833_v7  ;;  %881 = vst [vmem:[#allocation2 + $0x20] sm:$0xff] %v849_v8  ;;  %v1574_v13 = vadd.f32 %v1573_v10, %v1572_v5  ;;  %v1622_v14 = vadd.f32 %v1621_v12, %v1620_v6 }
 0x1c4   : > { %v834_v15 = vadd.f32 %v1574_v13, %v317_v9  ;;  %v850_v16 = vadd.f32 %v1622_v14, %v333_v11 }
 0x1c6   : > { %866 = vst [vmem:[#allocation2 + $0x78] sm:$0xff] %v834_v15  ;;  %882 = vst [vmem:[#allocation2 + $0x98] sm:$0xff] %v850_v16 }
 0x1c7 PF: > { %p1344_p11 = scmp.ne.s32.totalorder %s2047_s1, 1 }
 0x1c9   : > { %886 = sbr.rel (%p1344_p11) target bundleno = 488 (0x1e8), region = 56 }
 0x1ce   : > { %v887_v17 = vld [vmem:[#allocation2 + $0xb0] sm:$0xff]  ;;  %v888_v18 = vld [vmem:[#allocation2] sm:$0xff]  ;;  %v889_v22 = vld [vmem:[#allocation2 + $0xd8] sm:$0xff] }
 0x1cf   : > { %v2385_v19 = vld [vmem:[#allocation11] ss:$0 sm:$0xff]  ;;  %v890_v23 = vld [vmem:[#allocation2 + $0x18] sm:$0xff]  ;;  %v891_v24 = vld [vmem:[#allocation2 + $0x50] sm:$0xff] }
 0x1d0   : > { %v926_v20 = vadd.f32 %v2385_v19, %v887_v17  ;;  %v927_v21 = vadd.f32 %v2385_v19, %v888_v18  ;;  %v928_v25 = vadd.f32 %v2385_v19, %v889_v22  ;;  %v929_v26 = vadd.f32 %v2385_v19, %v890_v23  ;;  %v892_v27 = vld [vmem:[#allocation2 + $0x68] sm:$0xff]  ;;  %v893_v29 = vld [vmem:[#allocation2 + $0x30] sm:$0xff]  ;;  %v895_v35 = vld [vmem:[#allocation2 + $0x80] sm:$0xff] }
 0x1d1   : > { %v930_v28 = vadd.f32 %v2385_v19, %v891_v24  ;;  %v894_v30 = vld [vmem:[#allocation2 + $0x48] sm:$0xff]  ;;  %v931_v33 = vadd.f32 %v2385_v19, %v892_v27  ;;  %v932_v34 = vadd.f32 %v2385_v19, %v893_v29  ;;  %v898_v42 = vld [vmem:[#allocation2 + $0xb8] sm:$0xff]  ;;  %v899_v43 = vld [vmem:[#allocation2 + $0x60] sm:$0xff]  ;;  %v934_v47 = vadd.f32 %v2385_v19, %v895_v35 }
 0x1d2   : > { %v958_v31 = vmax.f32 %v926_v20, 0.0  ;;  %v959_v32 = vmax.f32 %v927_v21, 0.0  ;;  %v896_v36 = vld [vmem:[#allocation2 + $0x88] sm:$0xff]  ;;  %v960_v38 = vmax.f32 %v928_v25, 0.0  ;;  %v961_v39 = vmax.f32 %v929_v26, 0.0  ;;  %v900_v48 = vld [vmem:[#allocation2 + $0xf0] sm:$0xff] }
 0x1d3   : > { %v897_v37 = vld [vmem:[#allocation2 + $0xe8] sm:$0xff]  ;;  %v962_v40 = vmax.f32 %v930_v28, 0.0  ;;  %v933_v41 = vadd.f32 %v2385_v19, %v894_v30  ;;  %v963_v45 = vmax.f32 %v931_v33, 0.0  ;;  %v964_v46 = vmax.f32 %v932_v34, 0.0  ;;  %v902_v54 = vld [vmem:[#allocation2 + $0x78] sm:$0xff]  ;;  %v905_v1 = vld [vmem:[#allocation2 + $0x40] sm:$0xff] }
 0x1d4   : > { %v1419_v44 = vpack.c.bf16 %v959_v32, %v958_v31  ;;  %v1424_v49 = vpack.c.bf16 %v961_v39, %v960_v38  ;;  %v935_v51 = vadd.f32 %v2385_v19, %v896_v36  ;;  %v936_v52 = vadd.f32 %v2385_v19, %v897_v37  ;;  %v901_v53 = vld [vmem:[#allocation2 + $0x8] sm:$0xff]  ;;  %v903_v59 = vld [vmem:[#allocation2 + $0x38] sm:$0xff]  ;;  %v907_v11 = vld [vmem:[#allocation2 + $0xe0] sm:$0xff] }
 0x1d5   : > { %v965_v50 = vmax.f32 %v933_v41, 0.0  ;;  %v1429_v55 = vpack.c.bf16 %v963_v45, %v962_v40  ;;  %v966_v56 = vmax.f32 %v934_v47, 0.0  ;;  %v937_v57 = vadd.f32 %v2385_v19, %v898_v42  ;;  %v904_v60 = vld [vmem:[#allocation2 + $0x58] sm:$0xff]  ;;  %v906_v6 = vld [vmem:[#allocation2 + $0xc8] sm:$0xff]  ;;  %v908_v12 = vld [vmem:[#allocation2 + $0x90] sm:$0xff] }
 0x1d6   : > { %1420 = vst [vmem:[%s2327_s13] sm:$0xff] %v1419_v44   ;;  %v938_v58 = vadd.f32 %v2385_v19, %v899_v43  ;;  %1496 = vst [vmem:[%s2327_s13 + $0x8] sm:$0xff] %v1424_v49   ;;  %v967_v62 = vmax.f32 %v935_v51, 0.0  ;;  %v968_v63 = vmax.f32 %v936_v52, 0.0  ;;  %v939_v0 = vadd.f32 %v2385_v19, %v900_v48  ;;  %v909_v17 = vld [vmem:[#allocation2 + $0x70] sm:$0xff]  ;;  %v910_v18 = vld [vmem:[#allocation2 + $0xc0] sm:$0xff] }
 0x1d7   : > { %v1434_v61 = vpack.c.bf16 %v965_v50, %v964_v46  ;;  %1497 = vst [vmem:[%s2327_s13 + $0x10] sm:$0xff] %v1429_v55   ;;  %v969_v2 = vmax.f32 %v937_v57, 0.0  ;;  %v940_v4 = vadd.f32 %v2385_v19, %v901_v53  ;;  %v941_v5 = vadd.f32 %v2385_v19, %v902_v54  ;;  %v911_v24 = vld [vmem:[#allocation2 + $0xa8] sm:$0xff]  ;;  %v912_v25 = vld [vmem:[#allocation2 + $0xd0] sm:$0xff]  ;;  %v915_v40 = vld [vmem:[#allocation2 + $0xa0] sm:$0xff] }
 0x1d8   : > { %v970_v3 = vmax.f32 %v938_v58, 0.0  ;;  %v1439_v7 = vpack.c.bf16 %v967_v62, %v966_v56  ;;  %v971_v8 = vmax.f32 %v939_v0, 0.0  ;;  %v942_v9 = vadd.f32 %v2385_v19, %v903_v59  ;;  %v913_v30 = vld [vmem:[#allocation2 + $0x10] sm:$0xff]  ;;  %v914_v35 = vld [vmem:[#allocation2 + $0x28] sm:$0xff]  ;;  %v916_v41 = vld [vmem:[#allocation2 + $0xf8] sm:$0xff] }
 0x1d9   : > { %1498 = vst [vmem:[%s2327_s13 + $0x18] sm:$0xff] %v1434_v61   ;;  %v943_v10 = vadd.f32 %v2385_v19, %v904_v60  ;;  %v1444_v13 = vpack.c.bf16 %v969_v2, %v968_v63  ;;  %v972_v14 = vmax.f32 %v940_v4, 0.0  ;;  %v973_v15 = vmax.f32 %v941_v5, 0.0  ;;  %v917_v46 = vld [vmem:[#allocation2 + $0x20] sm:$0xff]  ;;  %v918_v47 = vld [vmem:[#allocation2 + $0x98] sm:$0xff] }
 0x1da   : > { %v944_v16 = vadd.f32 %v2385_v19, %v905_v1  ;;  %1499 = vst [vmem:[%s2327_s13 + $0x20] sm:$0xff] %v1439_v7   ;;  %v1449_v20 = vpack.c.bf16 %v971_v8, %v970_v3  ;;  %v974_v21 = vmax.f32 %v942_v9, 0.0  ;;  %v945_v23 = vadd.f32 %v2385_v19, %v906_v6 }
 0x1db   : > { %v975_v22 = vmax.f32 %v943_v10, 0.0  ;;  %1500 = vst [vmem:[%s2327_s13 + $0x28] sm:$0xff] %v1444_v13   ;;  %v1454_v26 = vpack.c.bf16 %v973_v15, %v972_v14  ;;  %v946_v28 = vadd.f32 %v2385_v19, %v907_v11  ;;  %v947_v29 = vadd.f32 %v2385_v19, %v908_v12 }
 0x1dc   : > { %v976_v27 = vmax.f32 %v944_v16, 0.0  ;;  %1501 = vst [vmem:[%s2327_s13 + $0x30] sm:$0xff] %v1449_v20   ;;  %v977_v32 = vmax.f32 %v945_v23, 0.0  ;;  %v948_v33 = vadd.f32 %v2385_v19, %v909_v17  ;;  %v949_v34 = vadd.f32 %v2385_v19, %v910_v18 }
 0x1dd   : > { %v1459_v31 = vpack.c.bf16 %v975_v22, %v974_v21  ;;  %1502 = vst [vmem:[%s2327_s13 + $0x38] sm:$0xff] %v1454_v26   ;;  %v978_v36 = vmax.f32 %v946_v28, 0.0  ;;  %v979_v37 = vmax.f32 %v947_v29, 0.0  ;;  %v950_v38 = vadd.f32 %v2385_v19, %v911_v24 }
 0x1de   : > { %v951_v39 = vadd.f32 %v2385_v19, %v912_v25  ;;  %v1464_v42 = vpack.c.bf16 %v977_v32, %v976_v27  ;;  %v980_v43 = vmax.f32 %v948_v33, 0.0  ;;  %v981_v44 = vmax.f32 %v949_v34, 0.0 }
 0x1df   : > { %1503 = vst [vmem:[%s2327_s13 + $0x40] sm:$0xff] %v1459_v31   ;;  %v952_v45 = vadd.f32 %v2385_v19, %v913_v30  ;;  %v1469_v48 = vpack.c.bf16 %v979_v37, %v978_v36  ;;  %v982_v49 = vmax.f32 %v950_v38, 0.0  ;;  %v953_v51 = vadd.f32 %v2385_v19, %v914_v35 }
 0x1e0   : > { %v983_v50 = vmax.f32 %v951_v39, 0.0  ;;  %1504 = vst [vmem:[%s2327_s13 + $0x48] sm:$0xff] %v1464_v42   ;;  %v1474_v52 = vpack.c.bf16 %v981_v44, %v980_v43  ;;  %v954_v54 = vadd.f32 %v2385_v19, %v915_v40  ;;  %v955_v55 = vadd.f32 %v2385_v19, %v916_v41 }
 0x1e1   : > { %v984_v53 = vmax.f32 %v952_v45, 0.0  ;;  %1505 = vst [vmem:[%s2327_s13 + $0x50] sm:$0xff] %v1469_v48   ;;  %v985_v57 = vmax.f32 %v953_v51, 0.0  ;;  %v956_v58 = vadd.f32 %v2385_v19, %v917_v46  ;;  %v957_v59 = vadd.f32 %v2385_v19, %v918_v47 }
 0x1e2   : > { %v1479_v56 = vpack.c.bf16 %v983_v50, %v982_v49  ;;  %1506 = vst [vmem:[%s2327_s13 + $0x58] sm:$0xff] %v1474_v52   ;;  %v986_v60 = vmax.f32 %v954_v54, 0.0  ;;  %v987_v61 = vmax.f32 %v955_v55, 0.0 }
 0x1e3   : > { %v1484_v62 = vpack.c.bf16 %v985_v57, %v984_v53  ;;  %v988_v63 = vmax.f32 %v956_v58, 0.0  ;;  %v989_v0 = vmax.f32 %v957_v59, 0.0 }
 0x1e4   : > { %1507 = vst [vmem:[%s2327_s13 + $0x60] sm:$0xff] %v1479_v56   ;;  %v1489_v1 = vpack.c.bf16 %v987_v61, %v986_v60 }
 0x1e5   : > { %1508 = vst [vmem:[%s2327_s13 + $0x68] sm:$0xff] %v1484_v62   ;;  %v1494_v2 = vpack.c.bf16 %v989_v0, %v988_v63 }
 0x1e6   : > { %1509 = vst [vmem:[%s2327_s13 + $0x70] sm:$0xff] %v1489_v1  }
 0x1e7   : > { %1510 = vst [vmem:[%s2327_s13 + $0x78] sm:$0xff] %v1494_v2  }
 0x1e8 PF: > { %s2558_s1 = sld [smem:[#allocation23_spill]]  ;;  %s1415_s5 = sshll.u32 %s2051_s29, 11 }
 0x1e9   : > { %s2559_s0 = sld [smem:[#allocation30_spill]]  ;;  %s1164_s18 = sshll.u32 %s2327_s13, 4  ;;  %s2442_s18 = int_to_ptr.vmem [resolvable:$true] %s1164_s18 }
 0x1ea   : > { %s2446_s15 = scalar_lea.sflag [#allocation8], %s247_s3  ;;  %s1937_s21 = scalar_lea.vmem %s2442_s18, 2048 }
 0x1eb   : > { %p1938_p6 = scmp.ne.s32.totalorder %s2442_s18, %s1937_s21  ;;  %s2076_s29 = smov [#allocation12]  }
 0x1ec   : > { %s1941_s22 = sshll.u32 %s2076_s29, 4  ;;  %s1942_s22 = int_to_ptr.vmem [resolvable:$false] %s1941_s22 }
 0x1ed   : > { %s1943_s20 = scalar_lea.vmem %s1942_s22, 4096  ;;  %p1944_p7 = scmp.lt.s32.totalorder %s2442_s18, %s1942_s22 }
 0x1ee   : > { %p2561_p12 = scmp.ne.s32.totalorder %s2558_s1, 0  ;;  %p1945_p3 = scmp.lt.s32.totalorder %s1943_s20, %s1937_s21 }
 0x1ef   : > { %s2560_s8 = smov %s2559_s0  ;;  %s2439_s9 = scalar_lea.hbm %s2559_s0, %s1415_s5 }
 0x1f0   : > { %p1939_p4 = pnand %p1938_p6, %p2561_p12  ;;  %p1946_p1 = por %p1945_p3, %p1944_p7 }
 0x1f2   : > { %p1940_p0 = pneg %p1939_p4 }
 0x1f4   : > { %p1947_p9 = pnand %p1946_p1, %p1940_p0 }
 0x1f6   : > { %1950 = shalt.err (!%p1947_p9)
}
 0x1f7   : > { %s1951_s16 = scalar_lea.hbm %s2439_s9, 2048  ;;  %s1955_s13 = scalar_lea.hbm %s2560_s8, 6144 }
 0x1f8   : > { %p1952_p10 = scmp.ne.s32.totalorder %s2439_s9, %s1951_s16  ;;  %p1956_p13 = scmp.lt.s32.totalorder %s2439_s9, %s2560_s8 }
 0x1f9   : > { %p1957_p8 = scmp.lt.s32.totalorder %s1955_s13, %s1951_s16 }
 0x1fa   : > { %p1953_p2 = pnand %p1952_p10, %p2561_p12 }
 0x1fb   : > { %p1958_p11 = por %p1957_p8, %p1956_p13 }
 0x1fc   : > { %p1954_p5 = pneg %p1953_p2 }
 0x1fe   : > { %p1959_p6 = pnand %p1958_p11, %p1954_p5 }
 0x200   : > { %1962 = shalt.err (!%p1959_p6)
}
 0x201   : > { %s2077_s14 = smov 64   ;;  %s2078_s30 = smov 4  }
 0x202   : > { %1652 = dma.vmem_to_hbm [thread:$0]  (%p2561_p12), %s2442_s18, 2048, %s2439_s9, %s2446_s15, %s2077_s14, %s2077_s14, %s2078_s30  }
 0x203 PF: > { %s2562_s24 = sld [smem:[#allocation22_spill]] }
 0x204   : > { %s2563_s17 = sld [smem:[#allocation19_spill]] }
 0x205   : > { %s2564_s4 = sld [smem:[#allocation24_spill]] }
 0x209   : > { %p1676_p4 = scmp.ge.s32.totalorder %s2562_s24, 2 }
 0x20a   : > { %s1179_s19 = sand.u32 1, %s2563_s17  }
 0x20b   : > { %p2565_p0 = scmp.ne.s32.totalorder %s2564_s4, 0  ;;  %s1180_s5 = scalar_lea.sflag [#allocation8], %s1179_s19 }
 0x20d   : > { %p1668_p7 = pnand %p1676_p4, %p2565_p0 }
 0x20f   : > { %p1669_p3 = pneg %p1668_p7 }
 0x211   : > { %2018 = dma.done.wait (%p1669_p3), %s1180_s5, 2048  }
 0x212   : > { %2020 = vsyncadd (%p1669_p3), %s1180_s5, 4294965248  ;;  %s28_s7 = sadd.s32 1, %s2562_s24   ;;  %s2566_s26 = sld [smem:[#allocation20_spill]] }
 0x213   : > { %p25_p1 = scmp.ge.s32.totalorder %s28_s7, 8   ;;  %s2567_s12 = sld [smem:[#allocation27_spill]] }
 0x214   : > { %s2568_s1 = sld [smem:[#allocation21_spill]]  ;;  %s2571_s24 = smov %s2027_s25 }
 0x215   : > { %s2569_s30 = sld [smem:[#allocation25_spill]]  ;;  %s2574_s0 = smov %s2039_s27 }
 0x216   : > { %s2570_s9 = sld [smem:[#allocation26_spill]]  ;;  %s2575_s27 = smov %s2043_s28 }
 0x217   : > { %s2576_s28 = smov %s2279_s23  ;;  %s2577_s29 = smov %s2059_s6 }
 0x218   : > { %s2572_s25 = smov %s2566_s26  ;;  %27 = sbr.rel (!%p25_p1) target bundleno = 19 (0x13), region = 98 }
 0x219   : > { %s2573_s26 = smov %s2567_s12 }
 0x21c   : > { %s2578_s6 = smov %s2570_s9 }
 0x21d   :  { %1185 = vsyncpa [#allocation7], 1 }
 0x21e   :  { %1187 = vsyncpa [#allocation7 + $0x1], 1 }
 0x21f   :  { %1188 = vsyncpa [#allocation10], 1 }
 0x220   :  { %1189 = vsyncpa [#allocation8], 1 }
 0x221   :  { %1191 = vsyncpa [#allocation8 + $0x1], 1 }

</bundles_post_ra>
